<compile_context>
chip_gen: v6e
topology: v6e:2x2x1
jax: 0.10.0
libtpu: 0.0.40
codegen_flags: <defaults>
</compile_context>

<pallas_src>
import functools

import jax
import jax.numpy as jnp
from jax.experimental import pallas as pl
from jax.experimental.pallas import tpu as pltpu


def _round_up(x, m):
    return (x + m - 1) // m * m


# ----------------------------------------------------------------------------
# Fused kernel: per-class NLL sums + per-class counts in one pass.
# ----------------------------------------------------------------------------
def _long_tail_kernel(x_ref, t_ref, nll_ref, cnt_ref):
    """One grid step.

    x_ref  : (C, TN) logits tile  -- classes on sublanes, rows on lanes.
    t_ref  : (1, TN) int32 targets tile (-1 marks padded rows).
    nll_ref: (1, C, 1) f32 resident per-split accumulator of per-class NLL sums.
    cnt_ref: (1, C, 1) i32 resident per-split accumulator of per-class counts.
    """
    j = pl.program_id(1)

    @pl.when(j == 0)
    def _():
        nll_ref[...] = jnp.zeros_like(nll_ref)
        cnt_ref[...] = jnp.zeros_like(cnt_ref)

    x = x_ref[...].astype(jnp.float32)                 # (C, TN)
    t = t_ref[...]                                     # (1, TN) int32

    # Numerically stable log-softmax along the class (sublane) axis.
    m = jnp.max(x, axis=0, keepdims=True)              # (1, TN)
    z = x - m
    s = jnp.sum(jnp.exp(z), axis=0, keepdims=True)     # (1, TN)
    log_s = jnp.log(s)                                 # (1, TN)

    class_ids = jax.lax.broadcasted_iota(jnp.int32, x.shape, 0)     # (C, TN)
    onehot = t == class_ids                            # (C, TN); all-False for pad rows

    # z at the target class (0 where no class matches, e.g. padded rows).
    z_t = jnp.sum(jnp.where(onehot, z, 0.0), axis=0, keepdims=True)  # (1, TN)
    nll = log_s - z_t                                  # (1, TN)

    # Per-class partial sums for this tile; padded / unmatched rows contribute 0.
    nll_part = jnp.sum(jnp.where(onehot, nll, 0.0), axis=1, keepdims=True)   # (C, 1) f32
    cnt_part = jnp.sum(onehot.astype(jnp.int32), axis=1, keepdims=True)      # (C, 1) i32

    nll_ref[...] += nll_part[None]
    cnt_ref[...] += cnt_part[None]


def _per_class_stats(x_t, t2d, *, num_classes, tile_n, num_splits, steps_per_split):
    c = num_classes
    spp = steps_per_split

    return pl.pallas_call(
        _long_tail_kernel,
        out_shape=(
            jax.ShapeDtypeStruct((num_splits, c, 1), jnp.float32),
            jax.ShapeDtypeStruct((num_splits, c, 1), jnp.int32),
        ),
        grid_spec=pltpu.PrefetchScalarGridSpec(
            num_scalar_prefetch=0,
            grid=(num_splits, spp),
            in_specs=[
                pl.BlockSpec((c, tile_n), lambda i, j: (0, i * spp + j)),   # logits^T
                pl.BlockSpec((1, tile_n), lambda i, j: (0, i * spp + j)),   # targets
            ],
            out_specs=[
                pl.BlockSpec((1, c, 1), lambda i, j: (i, 0, 0)),
                pl.BlockSpec((1, c, 1), lambda i, j: (i, 0, 0)),
            ],
        ),
        compiler_params=pltpu.CompilerParams(
            dimension_semantics=("parallel", "arbitrary"),
            vmem_limit_bytes=32 * 1024 * 1024,
        ),
    )(x_t, t2d)


# ----------------------------------------------------------------------------
# Full LongTailLoss forward
# ----------------------------------------------------------------------------
@functools.partial(jax.jit,
                   static_argnames=("num_classes", "beta", "tile_n", "num_splits"))
def long_tail_loss(inputs, targets, *, num_classes, beta=0.5, tile_n=None,
                   num_splits=2):
    c = num_classes
    logits = inputs.reshape(-1, c)           # keep caller dtype (bf16 ok, upcast in-kernel)
    t = targets.reshape(-1).astype(jnp.int32)
    n = t.shape[0]
    itemsize = jnp.dtype(logits.dtype).itemsize

    # VMEM-budgeted tile: ~2 MiB of logits per buffer, multiple of 128, <= 8192 rows.
    if tile_n is None:
        tile_n = (2 * 1024 * 1024) // (c * itemsize)
    tile_n = max(128, (min(int(tile_n), 8192) // 128) * 128)
    tile_n = min(tile_n, _round_up(n, 128))

    steps = -(-n // tile_n)
    splits = num_splits if steps >= num_splits else 1
    n_pad = _round_up(n, tile_n * splits)
    spp = n_pad // (tile_n * splits)

    pad = n_pad - n
    if pad:
        logits = jnp.pad(logits, ((0, pad), (0, 0)))
        t = jnp.pad(t, (0, pad), constant_values=-1)   # -1 matches no class -> ignored

    # Lane-dense layout plumbing (pure XLA): rows on the 128-lane axis, classes on sublanes.
    x_t = logits.T                         # (C, n_pad)
    t2d = t.reshape(1, n_pad)              # (1, n_pad)

    nll_parts, cnt_parts = _per_class_stats(
        x_t, t2d, num_classes=c, tile_n=tile_n,
        num_splits=splits, steps_per_split=spp)

    nll_c = jnp.sum(nll_parts[:, :, 0], axis=0)        # (C,) f32
    counts = jnp.sum(cnt_parts[:, :, 0], axis=0)       # (C,) int32
    counts_f = counts.astype(jnp.float32)

    # Class-balanced weights (size-C math), matching the PyTorch code.
    present = counts > 0
    safe_counts = jnp.where(present, counts_f, 1.0)
    raw_w = (1.0 - beta) / (1.0 - beta ** safe_counts)
    raw_w = jnp.where(present, raw_w, 0.0)
    num_present = jnp.sum(present.astype(jnp.float32))
    w = raw_w * num_present / jnp.sum(raw_w)
    w = jnp.where(present, w, 0.0)

    num = jnp.sum(w * nll_c)       # = sum_i w[y_i] * nll_i
    den = jnp.sum(w * counts_f)    # = sum_i w[y_i]
    # NOTE: den == 0 yields NaN, matching torch CrossEntropyLoss(weight=...) mean.
    # TODO(synk): out-of-range target indices are silently dropped here, whereas
    # PyTorch's CrossEntropyLoss raises an error.
    return num / den


# Pure-JAX reference (mirrors torch semantics) for verification.
def long_tail_loss_ref(inputs, targets, num_classes, beta=0.5):
    logits = inputs.reshape(-1, num_classes).astype(jnp.float32)
    t = targets.reshape(-1).astype(jnp.int32)
    counts = jnp.bincount(t, minlength=num_classes, length=num_classes).astype(jnp.float32)
    present = counts > 0
    raw_w = (1.0 - beta) / (1.0 - beta ** jnp.where(present, counts, 1.0))
    raw_w = jnp.where(present, raw_w, 0.0)
    w = raw_w * jnp.sum(present) / jnp.sum(raw_w)
    w = jnp.where(present, w, 0.0)
    logp = jax.nn.log_softmax(logits, axis=-1)
    nll = -jnp.take_along_axis(logp, t[:, None], axis=-1)[:, 0]
    wt = w[t]
    return jnp.sum(wt * nll) / jnp.sum(wt)


if __name__ == "__main__":
    # Segmentation-like shapes: batch=2, classes=8, spatial=16x15.
    # N=480 is not a multiple of 128, so the ragged/padding path is exercised.
    B, C, H, W = 2, 8, 16, 15
    N = B * H * W  # 480

    key = jax.random.PRNGKey(0)
    k1, k2 = jax.random.split(key)
    # Logits already laid out as (N, C), matching inputs.view(-1, num_classes).
    inputs = jax.random.normal(k1, (N, C), dtype=jnp.float32)
    # Only classes 0..4 appear -> classes 5,6,7 are absent (exercises long-tail path).
    targets = jax.random.randint(k2, (N,), 0, 5, dtype=jnp.int32)

    loss = long_tail_loss(inputs, targets, num_classes=C, beta=0.5)
    loss = jax.block_until_ready(loss)

    ref = long_tail_loss_ref(inputs, targets, C, beta=0.5)
    assert jnp.allclose(loss, ref, rtol=1e-5, atol=1e-5), (loss, ref)

    print("KERNEL_OK")
</pallas_src>

<mosaic_0001>
module attributes {stable_mosaic.version = 11 : i64} {
  func.func @_long_tail_kernel(%arg0: i32, %arg1: i32, %arg2: memref<8x512xf32, #tpu.memory_space<vmem>>, %arg3: memref<1x512xi32, #tpu.memory_space<vmem>>, %arg4: memref<1x8x1xf32, #tpu.memory_space<vmem>>, %arg5: memref<1x8x1xi32, #tpu.memory_space<vmem>>) attributes {dimension_semantics = [#tpu.dimension_semantics<parallel>, #tpu.dimension_semantics<arbitrary>], iteration_bounds = array<i64: 1, 1>, scalar_prefetch = 0 : i64, scratch_operands = 0 : i64, tpu.core_type = #tpu.core_type<tc>, window_params = [{transform_indices = @transform_0, window_bounds = array<i64: 8, 512>}, {transform_indices = @transform_1, window_bounds = array<i64: 1, 512>}, {transform_indices = @transform_2, window_bounds = array<i64: 1, 8, 1>}, {transform_indices = @transform_3, window_bounds = array<i64: 1, 8, 1>}]} {
    %c0_i32 = arith.constant 0 : i32
    %0 = arith.cmpi eq, %arg1, %c0_i32 : i32
    %1 = arith.extui %0 : i1 to i32
    %c0_i32_0 = arith.constant 0 : i32
    %2 = arith.cmpi ne, %1, %c0_i32_0 : i32
    scf.if %2 {
      %cst_22 = arith.constant 0.000000e+00 : f32
      %38 = vector.broadcast %cst_22 : f32 to vector<1x8x1xf32>
      %c0_23 = arith.constant 0 : index
      %c0_24 = arith.constant 0 : index
      %c0_25 = arith.constant 0 : index
      %39 = vector.load %arg4[%c0_23, %c0_24, %c0_25] : memref<1x8x1xf32, #tpu.memory_space<vmem>>, vector<1x8x1xf32>
      tpu.vector_store %arg4[%c0_23, %c0_24, %c0_25], %38 {strides = array<i32>} : memref<1x8x1xf32, #tpu.memory_space<vmem>>, vector<1x8x1xf32>,
      %c0_i32_26 = arith.constant 0 : i32
      %40 = vector.broadcast %c0_i32_26 : i32 to vector<1x8x1xi32>
      %c0_27 = arith.constant 0 : index
      %c0_28 = arith.constant 0 : index
      %c0_29 = arith.constant 0 : index
      %41 = vector.load %arg5[%c0_27, %c0_28, %c0_29] : memref<1x8x1xi32, #tpu.memory_space<vmem>>, vector<1x8x1xi32>
      tpu.vector_store %arg5[%c0_27, %c0_28, %c0_29], %40 {strides = array<i32>} : memref<1x8x1xi32, #tpu.memory_space<vmem>>, vector<1x8x1xi32>,
    } else {
    }
    %c0 = arith.constant 0 : index
    %c0_1 = arith.constant 0 : index
    %3 = vector.load %arg2[%c0, %c0_1] : memref<8x512xf32, #tpu.memory_space<vmem>>, vector<8x512xf32>
    %c0_2 = arith.constant 0 : index
    %c0_3 = arith.constant 0 : index
    %4 = vector.load %arg3[%c0_2, %c0_3] : memref<1x512xi32, #tpu.memory_space<vmem>>, vector<1x512xi32>
    %cst = arith.constant dense<0xFF800000> : vector<512xf32>
    %5 = vector.multi_reduction <maximumf>, %3, %cst [0] : vector<8x512xf32> to vector<512xf32>
    %6 = vector.shape_cast %5 : vector<512xf32> to vector<1x512xf32>
    %7 = vector.broadcast %6 : vector<1x512xf32> to vector<8x512xf32>
    %8 = arith.subf %3, %7 : vector<8x512xf32>
    %9 = math.exp %8 : vector<8x512xf32>
    %cst_4 = arith.constant dense<0.000000e+00> : vector<512xf32>
    %10 = vector.multi_reduction <add>, %9, %cst_4 [0] : vector<8x512xf32> to vector<512xf32>
    %11 = vector.shape_cast %10 : vector<512xf32> to vector<1x512xf32>
    %12 = math.log %11 : vector<1x512xf32>
    %13 = tpu.iota {dimensions = array<i32: 0>} : vector<8x512xi32>
    %14 = vector.broadcast %4 : vector<1x512xi32> to vector<8x512xi32>
    %15 = arith.cmpi eq, %14, %13 : vector<8x512xi32>
    %cst_5 = arith.constant 0.000000e+00 : f32
    %16 = vector.broadcast %cst_5 : f32 to vector<8x512xf32>
    %17 = arith.select %15, %8, %16 : vector<8x512xi1>, vector<8x512xf32>
    %cst_6 = arith.constant dense<0.000000e+00> : vector<512xf32>
    %18 = vector.multi_reduction <add>, %17, %cst_6 [0] : vector<8x512xf32> to vector<512xf32>
    %19 = vector.shape_cast %18 : vector<512xf32> to vector<1x512xf32>
    %20 = arith.subf %12, %19 : vector<1x512xf32>
    %cst_7 = arith.constant 0.000000e+00 : f32
    %21 = vector.shape_cast %20 : vector<1x512xf32> to vector<1x512xf32>
    %22 = vector.broadcast %21 : vector<1x512xf32> to vector<8x512xf32>
    %23 = vector.broadcast %cst_7 : f32 to vector<8x512xf32>
    %24 = arith.select %15, %22, %23 : vector<8x512xi1>, vector<8x512xf32>
    %cst_8 = arith.constant dense<0.000000e+00> : vector<8xf32>
    %25 = vector.multi_reduction <add>, %24, %cst_8 [1] : vector<8x512xf32> to vector<8xf32>
    %26 = vector.shape_cast %25 : vector<8xf32> to vector<8x1xf32>
    %27 = arith.extui %15 : vector<8x512xi1> to vector<8x512xi32>
    %cst_9 = arith.constant dense<0> : vector<8xi32>
    %28 = vector.multi_reduction <add>, %27, %cst_9 [1] : vector<8x512xi32> to vector<8xi32>
    %29 = vector.shape_cast %28 : vector<8xi32> to vector<8x1xi32>
    %c0_10 = arith.constant 0 : index
    %c0_11 = arith.constant 0 : index
    %c0_12 = arith.constant 0 : index
    %30 = vector.load %arg4[%c0_10, %c0_11, %c0_12] : memref<1x8x1xf32, #tpu.memory_space<vmem>>, vector<1x8x1xf32>
    %31 = vector.shape_cast %26 : vector<8x1xf32> to vector<1x8x1xf32>
    %32 = arith.addf %30, %31 : vector<1x8x1xf32>
    %c0_13 = arith.constant 0 : index
    %c0_14 = arith.constant 0 : index
    %c0_15 = arith.constant 0 : index
    %33 = vector.load %arg4[%c0_13, %c0_14, %c0_15] : memref<1x8x1xf32, #tpu.memory_space<vmem>>, vector<1x8x1xf32>
    tpu.vector_store %arg4[%c0_13, %c0_14, %c0_15], %32 {strides = array<i32>} : memref<1x8x1xf32, #tpu.memory_space<vmem>>, vector<1x8x1xf32>,
    %c0_16 = arith.constant 0 : index
    %c0_17 = arith.constant 0 : index
    %c0_18 = arith.constant 0 : index
    %34 = vector.load %arg5[%c0_16, %c0_17, %c0_18] : memref<1x8x1xi32, #tpu.memory_space<vmem>>, vector<1x8x1xi32>
    %35 = vector.shape_cast %29 : vector<8x1xi32> to vector<1x8x1xi32>
    %36 = arith.addi %34, %35 : vector<1x8x1xi32>
    %c0_19 = arith.constant 0 : index
    %c0_20 = arith.constant 0 : index
    %c0_21 = arith.constant 0 : index
    %37 = vector.load %arg5[%c0_19, %c0_20, %c0_21] : memref<1x8x1xi32, #tpu.memory_space<vmem>>, vector<1x8x1xi32>
    tpu.vector_store %arg5[%c0_19, %c0_20, %c0_21], %36 {strides = array<i32>} : memref<1x8x1xi32, #tpu.memory_space<vmem>>, vector<1x8x1xi32>,
    return
  }
  func.func @transform_0(%arg0: i32, %arg1: i32) -> (i32, i32) {
    %c1_i32 = arith.constant 1 : i32
    %0 = arith.muli %arg0, %c1_i32 : i32
    %1 = arith.addi %0, %arg1 : i32
    %c0_i32 = arith.constant 0 : i32
    %c0_i32_0 = arith.constant 0 : i32
    return %c0_i32, %1 : i32, i32
  }
  func.func @transform_1(%arg0: i32, %arg1: i32) -> (i32, i32) {
    %c1_i32 = arith.constant 1 : i32
    %0 = arith.muli %arg0, %c1_i32 : i32
    %1 = arith.addi %0, %arg1 : i32
    %c0_i32 = arith.constant 0 : i32
    %c0_i32_0 = arith.constant 0 : i32
    return %c0_i32, %1 : i32, i32
  }
  func.func @transform_2(%arg0: i32, %arg1: i32) -> (i32, i32, i32) {
    %c0_i32 = arith.constant 0 : i32
    %c0_i32_0 = arith.constant 0 : i32
    %c0_i32_1 = arith.constant 0 : i32
    return %arg0, %c0_i32, %c0_i32_0 : i32, i32, i32
  }
  func.func @transform_3(%arg0: i32, %arg1: i32) -> (i32, i32, i32) {
    %c0_i32 = arith.constant 0 : i32
    %c0_i32_0 = arith.constant 0 : i32
    %c0_i32_1 = arith.constant 0 : i32
    return %arg0, %c0_i32, %c0_i32_0 : i32, i32, i32
  }
}

</mosaic_0001>

<bundles_post_ra>
// kernel: long_tail_loss.1
= control target key start
LH: loop header
LB: loop body
LE: loop exit
PB: predicated region body
PF: predicated region fallthrough
CT: control target
= control target key end

     0   :  { %v134_v0 = vlaneseq  ;;  %v258_v27 = vmov 0   ;;  %vm58_vm4 = vcmask 7168   ;;  %s375_s1 = inlined_call_operand.vmem [shape: s32[1,512], index: 1, kind: input, shape index: {}]   ;;  %s376_s0 = inlined_call_operand.vmem [shape: f32[8,512], index: 0, kind: input, shape index: {}]   ;;  %s377_s3 = inlined_call_operand.vmem [shape: s32[1,8,1], index: 3, kind: output, shape index: {1}]   ;;  %s378_s2 = inlined_call_operand.vmem [shape: f32[1,8,1], index: 2, kind: output, shape index: {0}]  }
   0x1   :  { %v61_v1 = vld [vmem:[%s376_s0] sm:$0xff]  ;;  %v62_v2 = vld [vmem:[%s376_s0 + $0x8] sm:$0xff]  ;;  %v63_v4 = vld [vmem:[%s376_s0 + $0x10] sm:$0xff]  ;;  %60 = vst.msk [vmem:[%s377_s3] sm:$0xff] %vm58_vm4, %v258_v27 }
   0x2   :  { %v286_v3 = vshrl.u32 %v134_v0, 7  ;;  %v66_v5 = vrot.slane %v61_v1, 4  ;;  %v72_v6 = vrot.slane %v62_v2, 4  ;;  %v64_v7 = vld [vmem:[%s376_s0 + $0x18] sm:$0xff]  ;;  %v65_v8 = vld [vmem:[%s375_s1] sm:$0xf] }
   0x3   :  { %v78_v9 = vrot.slane %v63_v4, 4  ;;  %v84_v10 = vrot.slane %v64_v7, 4 }
   0x4   :  { %v138_v11 = vsub.s32 0, %v286_v3  ;;  %v142_v12 = vsub.s32 1, %v286_v3  ;;  %v146_v13 = vsub.s32 2, %v286_v3  ;;  %v150_v14 = vsub.s32 3, %v286_v3 }
   0x5   :  { %v67_v15 = vmax.f32 %v61_v1, %v66_v5  ;;  %v73_v16 = vmax.f32 %v62_v2, %v72_v6  ;;  %v79_v17 = vmax.f32 %v63_v4, %v78_v9  ;;  %v85_v18 = vmax.f32 %v64_v7, %v84_v10 }
   0x6   :  { %v301_v19 = vrot.slane %v65_v8, %v138_v11  ;;  %v303_v20 = vrot.slane %v65_v8, %v142_v12  ;;  %v305_v21 = vrot.slane %v65_v8, %v146_v13  ;;  %v307_v22 = vrot.slane %v65_v8, %v150_v14 }
   0x7   :  { %v68_v23 = vrot.slane %v67_v15, 2  ;;  %v74_v24 = vrot.slane %v73_v16, 2  ;;  %v80_v25 = vrot.slane %v79_v17, 2  ;;  %v86_v26 = vrot.slane %v85_v18, 2 }
   0x8   :  { %vm152_vm0 = vcmp.eq.s32.totalorder %v301_v19, %v286_v3  ;;  %vm153_vm1 = vcmp.eq.s32.totalorder %v303_v20, %v286_v3  ;;  %vm154_vm2 = vcmp.eq.s32.totalorder %v305_v21, %v286_v3  ;;  %vm155_vm3 = vcmp.eq.s32.totalorder %v307_v22, %v286_v3  ;;  %v220_v20 = vld [vmem:[%s377_s3] sm:$0xff] }
   0x9   :  { %v197_v28 = vsel %vm152_vm0, 1, %v258_v27  ;;  %v198_v29 = vsel %vm153_vm1, 1, %v258_v27  ;;  %v199_v30 = vsel %vm154_vm2, 1, %v258_v27  ;;  %v200_v31 = vsel %vm155_vm3, 1, %v258_v27 }
   0xa   :  { %v201_v32 = vadd.s32 %v198_v29, %v197_v28  ;;  %v202_v33 = vadd.s32 %v200_v31, %v199_v30  ;;  %v69_v34 = vmax.f32 %v67_v15, %v68_v23  ;;  %v75_v35 = vmax.f32 %v73_v16, %v74_v24 }
   0xb   :  { %v81_v36 = vmax.f32 %v79_v17, %v80_v25  ;;  %v87_v37 = vmax.f32 %v85_v18, %v86_v26  ;;  %v259_v16 = vmov 0.0  }
   0xc   :  { %v203_v38 = vadd.s32 %v202_v33, %v201_v32  ;;  %v70_v39 = vrot.slane %v69_v34, 1  ;;  %v76_v40 = vrot.slane %v75_v35, 1  ;;  %59 = vst.msk [vmem:[%s378_s2] sm:$0xff] %vm58_vm4, %v259_v16 }
   0xd   :  { %v82_v41 = vrot.slane %v81_v36, 1  ;;  %v88_v42 = vrot.slane %v87_v37, 1 }
   0xe   :  { %v205_v43 = vshrl.u32 %v203_v38, 16  ;;  %v71_v44 = vmax.f32 %v69_v34, %v70_v39  ;;  %v77_v45 = vmax.f32 %v75_v35, %v76_v40  ;;  %v204_v46 = vand.u32 65535, %v203_v38 }
   0xf   :  { %v83_v47 = vmax.f32 %v81_v36, %v82_v41  ;;  %v89_v48 = vmax.f32 %v87_v37, %v88_v42 }
  0x10   :  { %v207_v49 = vcvt.s32.f32 %v205_v43  ;;  %v90_v50 = vsub.f32 %v61_v1, %v71_v44  ;;  %v91_v51 = vsub.f32 %v62_v2, %v77_v45  ;;  %v206_v56 = vcvt.s32.f32 %v204_v46 }
  0x11   :  { %v92_v52 = vsub.f32 %v63_v4, %v83_v47  ;;  %v93_v53 = vsub.f32 %v64_v7, %v89_v48 }
  0x12   :  { %210 = vadd.xlane.f32.xlu0 %v207_v49  ;;  %v94_v54 = vmul.f32 1.442695, %v90_v50  ;;  %v96_v55 = vmul.f32 1.442695, %v91_v51  ;;  %v156_v61 = vsel %vm152_vm0, %v90_v50, 0.0  ;;  %v157_v2 = vsel %vm153_vm1, %v91_v51, 0.0 }
  0x13   :  { %v98_v57 = vmul.f32 1.442695, %v92_v52  ;;  %v100_v58 = vmul.f32 1.442695, %v93_v53  ;;  %v158_v6 = vsel %vm154_vm2, %v92_v52, 0.0  ;;  %v160_v7 = vrot.slane %v156_v61, 4 }
  0x14   :  { %242 = vpow2.f32 %v94_v54  ;;  %v159_v12 = vsel %vm155_vm3, %v93_v53, 0.0  ;;  %v166_v13 = vrot.slane %v157_v2, 4  ;;  %v172_v17 = vrot.slane %v158_v6, 4  ;;  %v216_v3 = vld [vmem:[%s378_s2] sm:$0xff] }
  0x15   :  { %244 = vpow2.f32 %v96_v55  ;;  %v178_v26 = vrot.slane %v159_v12, 4  ;;  %v161_v27 = vadd.f32 %v160_v7, %v156_v61 }
  0x16   :  { %246 = vpow2.f32 %v98_v57  ;;  %208 = vadd.xlane.f32.xlu0 %v206_v56  ;;  %v167_v30 = vadd.f32 %v166_v13, %v157_v2  ;;  %v173_v35 = vadd.f32 %v172_v17, %v158_v6 }
  0x17   :  { %248 = vpow2.f32 %v100_v58  ;;  %v179_v38 = vadd.f32 %v178_v26, %v159_v12  ;;  %v162_v40 = vrot.slane %v161_v27, 2 }
  0x18   :  { %v168_v42 = vrot.slane %v167_v30, 2  ;;  %v174_v43 = vrot.slane %v173_v35, 2 }
  0x19   :  { %v180_v44 = vrot.slane %v179_v38, 2  ;;  %v163_v45 = vadd.f32 %v162_v40, %v161_v27 }
  0x1a   :  { %v169_v46 = vadd.f32 %v168_v42, %v167_v30  ;;  %v175_v47 = vadd.f32 %v174_v43, %v173_v35 }
  0x1b   :  { %v181_v48 = vadd.f32 %v180_v44, %v179_v38  ;;  %v164_v49 = vrot.slane %v163_v45, 1 }
  0x1c   :  { %v170_v50 = vrot.slane %v169_v46, 1  ;;  %v176_v51 = vrot.slane %v175_v47, 1 }
  0x1d   :  { %v182_v52 = vrot.slane %v181_v48, 1  ;;  %v165_v53 = vadd.f32 %v164_v49, %v163_v45 }
  0x1e   :  { %v171_v55 = vadd.f32 %v170_v50, %v169_v46  ;;  %v177_v58 = vadd.f32 %v176_v51, %v175_v47 }
  0x1f   :  { %v183_v61 = vadd.f32 %v182_v52, %v181_v48 }
  0x21   :  { %v243_v59 = vpop.eup %242 }
  0x22   :  { %v245_v60 = vpop.eup %244  ;;  %v102_v62 = vrot.slane %v243_v59, 4 }
  0x23   :  { %v247_v63 = vpop.eup %246  ;;  %v108_v0 = vrot.slane %v245_v60, 4 }
  0x24   :  { %v249_v1 = vpop.eup %248  ;;  %v103_v4 = vadd.f32 %v243_v59, %v102_v62  ;;  %v114_v5 = vrot.slane %v247_v63, 4 }
  0x25   :  { %v109_v8 = vadd.f32 %v245_v60, %v108_v0  ;;  %v120_v9 = vrot.slane %v249_v1, 4 }
  0x26   :  { %v104_v10 = vrot.slane %v103_v4, 2  ;;  %v115_v11 = vadd.f32 %v247_v63, %v114_v5 }
  0x27   :  { %v110_v14 = vrot.slane %v109_v8, 2  ;;  %v121_v15 = vadd.f32 %v249_v1, %v120_v9 }
  0x28   :  { %v105_v18 = vadd.f32 %v104_v10, %v103_v4  ;;  %v116_v23 = vrot.slane %v115_v11, 2 }
  0x29   :  { %v111_v24 = vadd.f32 %v110_v14, %v109_v8  ;;  %v122_v25 = vrot.slane %v121_v15, 2 }
  0x2a   :  { %v106_v28 = vrot.slane %v105_v18, 1  ;;  %v117_v29 = vadd.f32 %v116_v23, %v115_v11 }
  0x2b   :  { %v112_v31 = vrot.slane %v111_v24, 1  ;;  %v123_v32 = vadd.f32 %v122_v25, %v121_v15 }
  0x2c   :  { %v107_v33 = vadd.f32 %v106_v28, %v105_v18  ;;  %v118_v34 = vrot.slane %v117_v29, 1 }
  0x2d   :  { %v113_v36 = vadd.f32 %v112_v31, %v111_v24  ;;  %v124_v37 = vrot.slane %v123_v32, 1 }
  0x2e   :  { %v119_v39 = vadd.f32 %v118_v34, %v117_v29  ;;  %250 = vlog2.f32 %v107_v33 }
  0x2f   :  { %v125_v41 = vadd.f32 %v124_v37, %v123_v32  ;;  %252 = vlog2.f32 %v113_v36 }
  0x30   :  { %254 = vlog2.f32 %v119_v39 }
  0x31   :  { %256 = vlog2.f32 %v125_v41 }
  0x3b   :  { %v251_v54 = vpop.eup %250 }
  0x3c   :  { %v253_v56 = vpop.eup %252  ;;  %v127_v57 = vmul.f32 0.6931472, %v251_v54 }
  0x3d   :  { %v255_v59 = vpop.eup %254  ;;  %v129_v60 = vmul.f32 0.6931472, %v253_v56 }
  0x3e   :  { %v257_v62 = vpop.eup %256  ;;  %v131_v63 = vmul.f32 0.6931472, %v255_v59  ;;  %v184_v0 = vsub.f32 %v127_v57, %v165_v53 }
  0x3f   :  { %v133_v1 = vmul.f32 0.6931472, %v257_v62  ;;  %v185_v2 = vsub.f32 %v129_v60, %v171_v55 }
  0x40   :  { %v186_v4 = vsub.f32 %v131_v63, %v177_v58  ;;  %v188_v5 = vsel %vm152_vm0, %v184_v0, 0.0 }
  0x41   :  { %v187_v6 = vsub.f32 %v133_v1, %v183_v61  ;;  %v189_v7 = vsel %vm153_vm1, %v185_v2, 0.0 }
  0x42   :  { %v190_v8 = vsel %vm154_vm2, %v186_v4, 0.0  ;;  %v192_v9 = vadd.f32 %v189_v7, %v188_v5 }
  0x43   :  { %v191_v10 = vsel %vm155_vm3, %v187_v6, 0.0 }
  0x44   :  { %v193_v11 = vadd.f32 %v192_v9, %v190_v8 }
  0x46   :  { %v194_v12 = vadd.f32 %v193_v11, %v191_v10 }
  0x48   :  { %195 = vadd.xlane.f32.xlu1 %v194_v12 }
  0x9b   :  { %v211_v13 = vpop.xlane.xlu0 %210 }
  0x9c   :  { %v213_v19 = vcvt.f32.s32 %v211_v13 }
  0x9e   :  { %v214_v14 = vshll.u32 %v213_v19, 16 }
  0x9f   :  { %v209_v15 = vpop.xlane.xlu0 %208 }
  0xa0   :  { %v212_v16 = vcvt.f32.s32 %v209_v15 }
  0xa2   :  { %v215_v17 = vadd.s32 %v214_v14, %v212_v16 }
  0xa4   :  { %v221_v21 = vadd.s32 %v220_v20, %v215_v17 }
  0xa6   :  { %222 = vst.msk [vmem:[%s377_s3] sm:$0xff] %vm58_vm4, %v221_v21 }
  0xd1   :  { %v196_v22 = vpop.xlane.xlu1 %195 }
  0xd2   :  { %v217_v18 = vadd.f32 %v216_v3, %v196_v22 }
  0xd4   :  { %219 = vst.msk [vmem:[%s378_s2] sm:$0xff] %vm58_vm4, %v217_v18 }

</bundles_post_ra>
